<compile_context>
chip_gen: v7x
topology: tpu7x:2x2x1
jax: 0.10.0
libtpu: 0.0.40
codegen_flags: <defaults>
</compile_context>

<pallas_src>
import jax
import jax.numpy as jnp
from jax import lax
from jax.experimental import pallas as pl
from jax.experimental.pallas import tpu as pltpu
import numpy as np


def decoder_kernel(x_ref, w_ref, wfc_ref, bihh_ref, bfc_ref, o_ref):
    B, H_in = x_ref.shape
    H = w_ref.shape[1]
    C = wfc_ref.shape[1]
    S = o_ref.shape[0] // B

    # Stacked weights: rows [0, H_in) = W_ih^T, rows [H_in, H_in+H) = W_hh^T.
    # Static, sublane-aligned slices -> free, loaded once, off the chain.
    w_ih_t = w_ref[:H_in, :]                                  # (H_in, H)
    w_hh_t = w_ref[H_in:, :]                                  # (H, H)

    # xs is the same vector at every timestep (torch .repeat), so the input
    # projection is time-invariant; b_ih + b_hh were folded in the wrapper.
    u = (jnp.dot(x_ref[...], w_ih_t, preferred_element_type=jnp.float32)
         + bihh_ref[...])                                     # (B, H)

    # Serial chain: only the (B,H)@(B==rows,H)@(H,H) recurrence matmul per
    # step. Fully unrolled (S is tiny) -> straight-line code for the LLO
    # scheduler; the independent FC work below fills MXU latency gaps.
    hs = []
    rec = jnp.zeros((B, H), jnp.float32)                      # h_0 @ W_hh^T = 0
    for s in range(S):
        h = jnp.tanh(u + rec)                                 # (B, H)
        hs.append(h)
        if s + 1 < S:                                         # last h feeds nothing
            rec = jnp.dot(h, w_hh_t, preferred_element_type=jnp.float32)

    # One batched, off-chain FC over all timesteps: sublane-concat the S
    # hidden states (s-major rows) and issue a single (S*B,H)@(H,C) matmul
    # plus one broadcast bias add.
    h_all = jnp.concatenate(hs, axis=0)                       # (S*B, H)
    logits = (jnp.dot(h_all, wfc_ref[...],
                      preferred_element_type=jnp.float32)
              + bfc_ref[...])                                 # (S*B, C)
    o_ref[...] = logits.astype(o_ref.dtype)


def decoder_forward(xs, params, sequence_length):
    """xs: (B, 1, H_in) float32 -> (B*S, n_note_class) float32."""
    w_ih, b_ih, w_hh, b_hh, w_fc, b_fc = params
    B, _, H_in = xs.shape
    H = w_hh.shape[0]
    C = w_fc.shape[0]
    S = sequence_length

    x2d = xs.reshape(B, H_in)
    w_inhh = jnp.concatenate([w_ih.T, w_hh.T], axis=0)        # (H_in + H, H)
    w_fc_t = w_fc.T                                           # (H, C)
    b_ihh = (b_ih + b_hh).reshape(1, H)                       # fold both RNN biases
    b_fc2 = b_fc.reshape(1, C)

    # NOTE(perf): at B=2 a single grid-less call on one TensorCore is right;
    # if B is ever scaled up, add a parallel grid axis over B-tiles
    # (dimension_semantics=("parallel",)) so v7x's second core gets half.
    out = pl.pallas_call(
        decoder_kernel,
        out_shape=jax.ShapeDtypeStruct((S * B, C), jnp.float32),
    )(x2d, w_inhh, w_fc_t, b_ihh, b_fc2)

    # s-major (S*B, C) -> torch's row-major (B*S, C). Tiny (1 KiB) wrapper-side
    # transpose; the reviewer's note: store-layout cost at this size is noise.
    return out.reshape(S, B, C).transpose(1, 0, 2).reshape(B * S, C)


def decoder_forward_ref(xs, params, sequence_length):
    """Pure-JAX reference mirroring the PyTorch forward."""
    w_ih, b_ih, w_hh, b_hh, w_fc, b_fc = params
    x = xs[:, 0, :]
    u = x @ w_ih.T + b_ih[0]

    def step(h, _):
        h = jnp.tanh(u + h @ w_hh.T + b_hh[0])
        return h, h @ w_fc.T + b_fc[0]

    h0 = jnp.zeros((x.shape[0], w_hh.shape[0]), jnp.float32)
    _, ys = lax.scan(step, h0, None, length=sequence_length)  # (S, B, C)
    return jnp.transpose(ys, (1, 0, 2)).reshape(-1, w_fc.shape[0])


def init_params(key, h_in, h_rnn, n_class):
    k = 1.0 / jnp.sqrt(jnp.float32(h_rnn))
    ks = jax.random.split(key, 6)
    uni = lambda kk, shape: jax.random.uniform(kk, shape, jnp.float32, -k, k)
    w_ih = uni(ks[0], (h_rnn, h_in))
    b_ih = uni(ks[1], (1, h_rnn))
    w_hh = uni(ks[2], (h_rnn, h_rnn))
    b_hh = uni(ks[3], (1, h_rnn))
    w_fc = uni(ks[4], (n_class, h_rnn))
    b_fc = uni(ks[5], (1, n_class))
    return (w_ih, b_ih, w_hh, b_hh, w_fc, b_fc)


if __name__ == "__main__":
    # HyperParams analogue (small, deterministic):
    B = 2
    cmp_hidden_size = 32          # input size to the decoder RNN
    cmp_dec_rnn_hidden_size = 32
    data_resolution_nth_note = 4
    data_length_bars = 2
    sequence_length = data_resolution_nth_note * data_length_bars  # 8
    data_note_low, data_note_high = 60, 75
    n_note_class = data_note_high - data_note_low + 1               # 16

    key = jax.random.PRNGKey(0)
    k_x, k_p = jax.random.split(key)
    xs = jax.random.normal(k_x, (B, 1, cmp_hidden_size), jnp.float32)
    params = init_params(k_p, cmp_hidden_size, cmp_dec_rnn_hidden_size,
                         n_note_class)

    out = decoder_forward(xs, params, sequence_length)
    out = jax.block_until_ready(out)

    ref = decoder_forward_ref(xs, params, sequence_length)
    np.testing.assert_allclose(np.asarray(out), np.asarray(ref),
                               rtol=1e-5, atol=1e-5)
    assert out.shape == (B * sequence_length, n_note_class)

    print("KERNEL_OK")
</pallas_src>

<mosaic_0001>
module attributes {stable_mosaic.version = 11 : i64} {
  func.func @decoder_kernel(%arg0: memref<2x32xf32, #tpu.memory_space<vmem>>, %arg1: memref<64x32xf32, #tpu.memory_space<vmem>>, %arg2: memref<32x16xf32, #tpu.memory_space<vmem>>, %arg3: memref<1x32xf32, #tpu.memory_space<vmem>>, %arg4: memref<1x16xf32, #tpu.memory_space<vmem>>, %arg5: memref<16x16xf32, #tpu.memory_space<vmem>>) attributes {dimension_semantics = [], scalar_prefetch = 0 : i64, scratch_operands = 0 : i64, tpu.core_type = #tpu.core_type<tc>} {
    %c0 = arith.constant 0 : index
    %c0_0 = arith.constant 0 : index
    %0 = vector.load %arg1[%c0, %c0_0] : memref<64x32xf32, #tpu.memory_space<vmem>>, vector<32x32xf32>
    %c32 = arith.constant 32 : index
    %c0_1 = arith.constant 0 : index
    %1 = vector.load %arg1[%c32, %c0_1] : memref<64x32xf32, #tpu.memory_space<vmem>>, vector<32x32xf32>
    %c0_2 = arith.constant 0 : index
    %c0_3 = arith.constant 0 : index
    %2 = vector.load %arg0[%c0_2, %c0_3] : memref<2x32xf32, #tpu.memory_space<vmem>>, vector<2x32xf32>
    %cst = arith.constant dense<0.000000e+00> : vector<2x32xf32>
    %3 = tpu.matmul %2, %0, %cst {dimension_numbers = #tpu.dot_dimension_numbers<[1], [0], [0], [1], [0, 0, 1, 1], [], []>} : vector<2x32xf32>, vector<32x32xf32>, vector<2x32xf32> -> vector<2x32xf32>
    %c0_4 = arith.constant 0 : index
    %c0_5 = arith.constant 0 : index
    %4 = vector.load %arg3[%c0_4, %c0_5] : memref<1x32xf32, #tpu.memory_space<vmem>>, vector<1x32xf32>
    %5 = vector.broadcast %4 : vector<1x32xf32> to vector<2x32xf32>
    %6 = arith.addf %3, %5 : vector<2x32xf32>
    %cst_6 = arith.constant 0.000000e+00 : f32
    %7 = vector.broadcast %cst_6 : f32 to vector<2x32xf32>
    %8 = arith.addf %6, %7 : vector<2x32xf32>
    %9 = math.tanh %8 : vector<2x32xf32>
    %cst_7 = arith.constant dense<0.000000e+00> : vector<2x32xf32>
    %10 = tpu.matmul %9, %1, %cst_7 {dimension_numbers = #tpu.dot_dimension_numbers<[1], [0], [0], [1], [0, 0, 1, 1], [], []>} : vector<2x32xf32>, vector<32x32xf32>, vector<2x32xf32> -> vector<2x32xf32>
    %11 = arith.addf %6, %10 : vector<2x32xf32>
    %12 = math.tanh %11 : vector<2x32xf32>
    %cst_8 = arith.constant dense<0.000000e+00> : vector<2x32xf32>
    %13 = tpu.matmul %12, %1, %cst_8 {dimension_numbers = #tpu.dot_dimension_numbers<[1], [0], [0], [1], [0, 0, 1, 1], [], []>} : vector<2x32xf32>, vector<32x32xf32>, vector<2x32xf32> -> vector<2x32xf32>
    %14 = arith.addf %6, %13 : vector<2x32xf32>
    %15 = math.tanh %14 : vector<2x32xf32>
    %cst_9 = arith.constant dense<0.000000e+00> : vector<2x32xf32>
    %16 = tpu.matmul %15, %1, %cst_9 {dimension_numbers = #tpu.dot_dimension_numbers<[1], [0], [0], [1], [0, 0, 1, 1], [], []>} : vector<2x32xf32>, vector<32x32xf32>, vector<2x32xf32> -> vector<2x32xf32>
    %17 = arith.addf %6, %16 : vector<2x32xf32>
    %18 = math.tanh %17 : vector<2x32xf32>
    %cst_10 = arith.constant dense<0.000000e+00> : vector<2x32xf32>
    %19 = tpu.matmul %18, %1, %cst_10 {dimension_numbers = #tpu.dot_dimension_numbers<[1], [0], [0], [1], [0, 0, 1, 1], [], []>} : vector<2x32xf32>, vector<32x32xf32>, vector<2x32xf32> -> vector<2x32xf32>
    %20 = arith.addf %6, %19 : vector<2x32xf32>
    %21 = math.tanh %20 : vector<2x32xf32>
    %cst_11 = arith.constant dense<0.000000e+00> : vector<2x32xf32>
    %22 = tpu.matmul %21, %1, %cst_11 {dimension_numbers = #tpu.dot_dimension_numbers<[1], [0], [0], [1], [0, 0, 1, 1], [], []>} : vector<2x32xf32>, vector<32x32xf32>, vector<2x32xf32> -> vector<2x32xf32>
    %23 = arith.addf %6, %22 : vector<2x32xf32>
    %24 = math.tanh %23 : vector<2x32xf32>
    %cst_12 = arith.constant dense<0.000000e+00> : vector<2x32xf32>
    %25 = tpu.matmul %24, %1, %cst_12 {dimension_numbers = #tpu.dot_dimension_numbers<[1], [0], [0], [1], [0, 0, 1, 1], [], []>} : vector<2x32xf32>, vector<32x32xf32>, vector<2x32xf32> -> vector<2x32xf32>
    %26 = arith.addf %6, %25 : vector<2x32xf32>
    %27 = math.tanh %26 : vector<2x32xf32>
    %cst_13 = arith.constant dense<0.000000e+00> : vector<2x32xf32>
    %28 = tpu.matmul %27, %1, %cst_13 {dimension_numbers = #tpu.dot_dimension_numbers<[1], [0], [0], [1], [0, 0, 1, 1], [], []>} : vector<2x32xf32>, vector<32x32xf32>, vector<2x32xf32> -> vector<2x32xf32>
    %29 = arith.addf %6, %28 : vector<2x32xf32>
    %30 = math.tanh %29 : vector<2x32xf32>
    %31 = tpu.concatenate %9, %12, %15, %18, %21, %24, %27, %30 in 0 : vector<2x32xf32>, vector<2x32xf32>, vector<2x32xf32>, vector<2x32xf32>, vector<2x32xf32>, vector<2x32xf32>, vector<2x32xf32>, vector<2x32xf32> -> vector<16x32xf32>
    %c0_14 = arith.constant 0 : index
    %c0_15 = arith.constant 0 : index
    %32 = vector.load %arg2[%c0_14, %c0_15] : memref<32x16xf32, #tpu.memory_space<vmem>>, vector<32x16xf32>
    %cst_16 = arith.constant dense<0.000000e+00> : vector<16x16xf32>
    %33 = tpu.matmul %31, %32, %cst_16 {dimension_numbers = #tpu.dot_dimension_numbers<[1], [0], [0], [1], [0, 0, 1, 1], [], []>} : vector<16x32xf32>, vector<32x16xf32>, vector<16x16xf32> -> vector<16x16xf32>
    %c0_17 = arith.constant 0 : index
    %c0_18 = arith.constant 0 : index
    %34 = vector.load %arg4[%c0_17, %c0_18] : memref<1x16xf32, #tpu.memory_space<vmem>>, vector<1x16xf32>
    %35 = vector.broadcast %34 : vector<1x16xf32> to vector<16x16xf32>
    %36 = arith.addf %33, %35 : vector<16x16xf32>
    %c0_19 = arith.constant 0 : index
    %c0_20 = arith.constant 0 : index
    %37 = vector.load %arg5[%c0_19, %c0_20] : memref<16x16xf32, #tpu.memory_space<vmem>>, vector<16x16xf32>
    tpu.vector_store %arg5[%c0_19, %c0_20], %36 {strides = array<i32>} : memref<16x16xf32, #tpu.memory_space<vmem>>, vector<16x16xf32>,
    return
  }
}

</mosaic_0001>

<bundles_post_ra>
// kernel: tpu_custom_call.1
= control target key start
LH: loop header
LB: loop body
LE: loop exit
PB: predicated region body
PF: predicated region fallthrough
CT: control target
= control target key end

     0   :  { %v1030_v3 = vmov 0.0|0.0   ;;  %vm1031_vm0 = vmmov 0   ;;  %v1032_v6 = vmov 0.0   ;;  %s1199_s0 = inlined_call_operand.vmem [shape: f32[2,32], index: 0, kind: input, shape index: {}]   ;;  %s1200_s1 = inlined_call_operand.vmem [shape: f32[64,32], index: 1, kind: input, shape index: {}]   ;;  %s1201_s2 = inlined_call_operand.vmem [shape: f32[32,16], index: 2, kind: input, shape index: {}]   ;;  %s1202_s3 = inlined_call_operand.vmem [shape: f32[1,32], index: 3, kind: input, shape index: {}]   ;;  %s1203_s4 = inlined_call_operand.vmem [shape: f32[1,16], index: 4, kind: input, shape index: {}]   ;;  %s1204_s5 = inlined_call_operand.hbm [shape: f32[16,16], index: 5, kind: output, shape index: {}]  }
   0x1   :  { %v21_v0 = vld [vmem:[%s1200_s1] sm:$0xff]  ;;  %v22_v1 = vld [vmem:[%s1200_s1 + $0x8] sm:$0xff]  ;;  %v23_v2 = vld [vmem:[%s1200_s1 + $0x10] sm:$0xff]  ;;  %928 = vmatprep.subr.bf16.mxu0 %v1030_v3  ;;  %837 = vmatprep.mubr.msk.f32.mxu0 %vm1031_vm0, %v1032_v6 }
   0x2   :  { %v929_v4 = vpack.c.bf16 %v22_v1, %v21_v0  ;;  %v24_v5 = vld [vmem:[%s1200_s1 + $0x18] sm:$0xff]  ;;  %934 = vmatprep.subr.bf16.mxu1 %v1030_v3  ;;  %848 = vmatprep.mubr.msk.f32.mxu1 %vm1031_vm0, %v1032_v6 }
   0x3   :  { %10 = vsyncpa [#allocation3], 0  ;;  %v932_v7 = vpack.c.bf16 %v24_v5, %v23_v2  ;;  %v29_v8 = vld [vmem:[%s1199_s0] sm:$0x3]  ;;  %vm37_vm1 = vcmask 261120   ;;  %v26_v10 = vld [vmem:[%s1200_s1 + $0x28] sm:$0xff] }
   0x4   :  { %930 = vmatpush3.bf16.msra.mxu0 %v929_v4  ;;  %v25_v9 = vld [vmem:[%s1200_s1 + $0x20] sm:$0xff]  ;;  %v27_v11 = vld [vmem:[%s1200_s1 + $0x30] sm:$0xff]  ;;  %v28_v13 = vld [vmem:[%s1200_s1 + $0x38] sm:$0xff]  ;;  %vm651_vm2 = vcmask 1041408   ;;  %vm653_vm3 = vcmask 1043456   ;;  %vm655_vm4 = vcmask 1045504  }
   0x5   :  { %931 = vmatprep.subr.bf16.mxu0 %v1030_v3  ;;  %v1101_v12 = vpack.c.bf16 %v26_v10, %v25_v9  ;;  %v1107_v14 = vpack.c.bf16 %v28_v13, %v27_v11  ;;  %v771_v15 = vld [vmem:[%s1202_s3] ss:$0 sm:$0xff]  ;;  %v661_v55 = vld [vmem:[%s1201_s2 + $0x8] sm:$0xff]  ;;  %v662_v57 = vld [vmem:[%s1201_s2 + $0x10] sm:$0xff]  ;;  %s1033_s20 = smov [#allocation2]   ;;  %vm752_vm5 = vcmask 130048  }
   0x6   :  { %v660_v54 = vld [vmem:[%s1201_s2] sm:$0xff]  ;;  %v663_v58 = vld [vmem:[%s1201_s2 + $0x18] sm:$0xff]  ;;  %s760_s2 = sshll.u32 %s1033_s20, 4  ;;  %s761_s2 = int_to_ptr.vmem [resolvable:$true] %s760_s2 }
   0x7   :  { %936 = vmatpush3.bf16.msra.mxu1 %v1101_v12  ;;  %v976_v56 = vpack.c.bf16 %v661_v55, %v660_v54  ;;  %v980_v59 = vpack.c.bf16 %v663_v58, %v662_v57  ;;  %v780_v2 = vld [vmem:[%s1203_s4] ss:$0 sm:$0xff]  ;;  %s1006_s21 = scalar_lea.vmem %s761_s2, 256  ;;  %p1011_p1 = scmp.lt.s32.totalorder %s761_s2, %s761_s2 }
   0x8   :  { %933 = vmatpush3.bf16.msra.mxu0 %v932_v7  ;;  %937 = vmatprep.subr.bf16.mxu1 %v1030_v3  ;;  %p1007_p0 = scmp.ne.s32.totalorder %s761_s2, %s1006_s21  ;;  %p1012_p2 = scmp.lt.s32.totalorder %s1006_s21, %s1006_s21 }
   0x9   :  { %940 = vmatprep.subr.bf16.mxu0 %v1030_v3 }
   0xa   :  { %p1013_p3 = por %p1012_p2, %p1011_p1 }
   0xb   :  { %838 = vmatmul.mubr.msk.f32.vlgmr.msra.gmra.mrb[0].mxu0 %vm37_vm1, %v29_v8  ;;  %939 = vmatpush3.bf16.msra.mxu1 %v1107_v14 }
   0xc   :  { %859 = vmatprep.mubr.msk.f32.mxu0 %vm1031_vm0, %v1032_v6  ;;  %942 = vmatpush3.bf16.msra.mxu0 %v1101_v12  ;;  %p1014_p4 = pnand %p1013_p3, %p1007_p0 }
   0xd   :  { %943 = vmatprep.subr.bf16.mxu0 %v1030_v3  ;;  %946 = vmatprep.subr.bf16.mxu1 %v1030_v3 }
  0x10   :  { %945 = vmatpush3.bf16.msra.mxu0 %v1107_v14 }
  0x11   :  { %952 = vmatprep.subr.bf16.mxu0 %v1030_v3 }
  0xde   :  { %v107_v16 = vpop.f32.mrb[0].mxu0 }
  0xdf   :  { %v1119_v17 = vadd.f32 %v771_v15, %v107_v16  ;;  %v839_v18 = vpop.f32.mrb[1].mxu0 }
  0xe1   :  { %990 = vtanh.f32 %v1119_v17 }
  0xeb   :  { %v991_v19 = vpop.eup %990 }
  0xec   :  { %849 = vmatmul.mubr.msk.f32.vlgmr.msra.gmra.mrb[0].mxu1 %vm37_vm1, %v991_v19 }
  0xed   :  { %948 = vmatpush3.bf16.msra.mxu1 %v1101_v12  ;;  %870 = vmatprep.mubr.msk.f32.mxu1 %vm1031_vm0, %v1032_v6 }
  0xee   :  { %949 = vmatprep.subr.bf16.mxu1 %v1030_v3 }
  0xf1   :  { %951 = vmatpush3.bf16.msra.mxu1 %v1107_v14 }
  0xf2   :  { %958 = vmatprep.subr.bf16.mxu1 %v1030_v3 }
 0x1bf   :  { %v182_v20 = vpop.f32.mrb[0].mxu1 }
 0x1c0   :  { %v186_v21 = vadd.f32 %v182_v20, %v1119_v17  ;;  %v850_v22 = vpop.f32.mrb[1].mxu1 }
 0x1c2   :  { %992 = vtanh.f32 %v186_v21 }
 0x1cc   :  { %v993_v23 = vpop.eup %992 }
 0x1cd   :  { %860 = vmatmul.mubr.msk.f32.vlgmr.msra.gmra.mrb[2].mxu0 %vm37_vm1, %v993_v23  ;;  %v638_v27 = vrot.slane %v993_v23, 6 }
 0x1ce   :  { %954 = vmatpush3.bf16.msra.mxu0 %v1101_v12  ;;  %881 = vmatprep.mubr.msk.f32.mxu0 %vm1031_vm0, %v1032_v6 }
 0x1cf   :  { %955 = vmatprep.subr.bf16.mxu0 %v1030_v3  ;;  %v652_v30 = vsel %vm651_vm2, %v991_v19, %v638_v27 }
 0x1d2   :  { %957 = vmatpush3.bf16.msra.mxu0 %v1107_v14 }
 0x1d3   :  { %964 = vmatprep.subr.bf16.mxu0 %v1030_v3 }
 0x2a0   :  { %v257_v24 = vpop.f32.mrb[2].mxu0 }
 0x2a1   :  { %v261_v25 = vadd.f32 %v257_v24, %v1119_v17  ;;  %v861_v26 = vpop.f32.mrb[3].mxu0 }
 0x2a3   :  { %994 = vtanh.f32 %v261_v25 }
 0x2ad   :  { %v995_v28 = vpop.eup %994 }
 0x2ae   :  { %871 = vmatmul.mubr.msk.f32.vlgmr.msra.gmra.mrb[2].mxu1 %vm37_vm1, %v995_v28  ;;  %v640_v29 = vrot.slane %v995_v28, 4 }
 0x2af   :  { %960 = vmatpush3.bf16.msra.mxu1 %v1101_v12  ;;  %892 = vmatprep.mubr.msk.f32.mxu1 %vm1031_vm0, %v1032_v6 }
 0x2b0   :  { %961 = vmatprep.subr.bf16.mxu1 %v1030_v3  ;;  %v654_v31 = vsel %vm653_vm3, %v652_v30, %v640_v29 }
 0x2b3   :  { %963 = vmatpush3.bf16.msra.mxu1 %v1107_v14 }
 0x2b4   :  { %970 = vmatprep.subr.bf16.mxu1 %v1030_v3 }
 0x381   :  { %v332_v32 = vpop.f32.mrb[2].mxu1 }
 0x382   :  { %v336_v33 = vadd.f32 %v332_v32, %v1119_v17  ;;  %v872_v34 = vpop.f32.mrb[3].mxu1 }
 0x384   :  { %996 = vtanh.f32 %v336_v33 }
 0x38e   :  { %v997_v35 = vpop.eup %996 }
 0x38f   :  { %882 = vmatmul.mubr.msk.f32.vlgmr.msra.gmra.mrb[4].mxu0 %vm37_vm1, %v997_v35  ;;  %v642_v36 = vrot.slane %v997_v35, 2 }
 0x390   :  { %966 = vmatpush3.bf16.msra.mxu0 %v1101_v12  ;;  %903 = vmatprep.mubr.msk.f32.mxu0 %vm1031_vm0, %v1032_v6 }
 0x391   :  { %967 = vmatprep.subr.bf16.mxu0 %v1030_v3  ;;  %v656_v37 = vsel %vm655_vm4, %v654_v31, %v642_v36 }
 0x394   :  { %969 = vmatpush3.bf16.msra.mxu0 %v1107_v14 }
 0x395   :  { %977 = vmatprep.subr.bf16.mxu0 %v976_v56 }
 0x462   :  { %v407_v38 = vpop.f32.mrb[4].mxu0 }
 0x463   :  { %v411_v39 = vadd.f32 %v407_v38, %v1119_v17  ;;  %v883_v40 = vpop.f32.mrb[5].mxu0 }
 0x465   :  { %998 = vtanh.f32 %v411_v39 }
 0x46f   :  { %v999_v41 = vpop.eup %998 }
 0x470   :  { %893 = vmatmul.mubr.msk.f32.vlgmr.msra.gmra.mrb[4].mxu1 %vm37_vm1, %v999_v41 }
 0x471   :  { %972 = vmatpush3.bf16.msra.mxu1 %v1101_v12  ;;  %914 = vmatprep.mubr.msk.f32.mxu1 %vm1031_vm0, %v1032_v6 }
 0x472   :  { %973 = vmatprep.subr.bf16.mxu1 %v1030_v3 }
 0x475   :  { %975 = vmatpush3.bf16.msra.mxu1 %v1107_v14 }
 0x543   :  { %v482_v42 = vpop.f32.mrb[4].mxu1 }
 0x544   :  { %v486_v43 = vadd.f32 %v482_v42, %v1119_v17  ;;  %v894_v44 = vpop.f32.mrb[5].mxu1 }
 0x546   :  { %1000 = vtanh.f32 %v486_v43 }
 0x550   :  { %v1001_v45 = vpop.eup %1000 }
 0x551   :  { %904 = vmatmul.mubr.msk.f32.vlgmr.msra.gmra.mrb[6].mxu0 %vm37_vm1, %v1001_v45  ;;  %v644_v49 = vrot.slane %v1001_v45, 6 }
 0x552   :  { %925 = vmatprep.mubr.msk.f32.mxu0 %vm37_vm1, %v656_v37  ;;  %979 = vmatpush3.bf16.msra.mxu0 %v976_v56 }
 0x553   :  { %v657_v52 = vsel %vm651_vm2, %v999_v41, %v644_v49  ;;  %981 = vmatprep.subr.bf16.mxu0 %v980_v59 }
 0x556   :  { %983 = vmatpush3.bf16.msra.mxu0 %v980_v59 }
 0x624   :  { %v557_v46 = vpop.f32.mrb[6].mxu0 }
 0x625   :  { %v561_v47 = vadd.f32 %v557_v46, %v1119_v17  ;;  %v905_v48 = vpop.f32.mrb[7].mxu0 }
 0x627   :  { %1002 = vtanh.f32 %v561_v47 }
 0x631   :  { %v1003_v50 = vpop.eup %1002 }
 0x632   :  { %v646_v51 = vrot.slane %v1003_v50, 4  ;;  %915 = vmatmul.mubr.msk.f32.vlgmr.msra.gmra.mrb[6].mxu1 %vm37_vm1, %v1003_v50 }
 0x634   :  { %v658_v53 = vsel %vm653_vm3, %v657_v52, %v646_v51 }
 0x705   :  { %v632_v60 = vpop.f32.mrb[6].mxu1 }
 0x706   :  { %v636_v61 = vadd.f32 %v632_v60, %v1119_v17  ;;  %v916_v62 = vpop.f32.mrb[7].mxu1 }
 0x708   :  { %1004 = vtanh.f32 %v636_v61 }
 0x712   :  { %v1005_v63 = vpop.eup %1004 }
 0x713   :  { %v649_v0 = vrot.slane %v1005_v63, 2 }
 0x715   :  { %v659_v1 = vsel %vm655_vm4, %v658_v53, %v649_v0 }
 0x716   :  { %926 = vmatmul.mubr.msk.f32.vlgmr.msra.gmra.mrb[8].mxu0 %vm37_vm1, %v659_v1 }
 0x7e9   :  { %v927_v3 = vpop.f32.mrb[8].mxu0 }
 0x7ea   :  { %v749_v4 = vadd.f32 %v927_v3, %v780_v2  ;;  %v743_v5 = vpop.f32.mrb[9].mxu0 }
 0x7eb   :  { %v744_v6 = vadd.f32 %v780_v2, %v743_v5 }
 0x7ec   :  { %754 = vst.msk [vmem:[#allocation2 + $0x8] sm:$0xff] %vm752_vm5, %v749_v4 }
 0x7ed   :  { %753 = vst.msk [vmem:[#allocation2] sm:$0xff] %vm752_vm5, %v744_v6 }
 0x7ee   :  { %1017 = shalt.err (!%p1014_p4)
}
 0x7ef   :  { %s1018_s4 = scalar_lea.hbm %s1204_s5, 256 }
 0x7f0   :  { %p1019_p5 = scmp.ne.s32.totalorder %s1204_s5, %s1018_s4  ;;  %p1022_p6 = scmp.lt.u32.totalorder %s1018_s4, %s1204_s5 }
 0x7f2   :  { %p1024_p7 = pnand %p1022_p6, %p1019_p5 }
 0x7f4   :  { %1027 = shalt.err (!%p1024_p7)
}
 0x7f5   :  { %s1034_s28 = smov 128   ;;  %s1035_s29 = smov 8  }
 0x7f6   :  { %766 = dma.vmem_to_hbm [thread:$0]  %s761_s2, 256, %s1204_s5, [#allocation3], %s1034_s28, %s1034_s28, %s1035_s29  }
 0x7f7   :  { %1028 = dma.done.wait [#allocation3], 256  }
 0x7f8   :  { %1029 = vsyncadd [#allocation3], 4294967040 }
 0x7f9   :  { %770 = vsyncpa [#allocation3], 1 }

</bundles_post_ra>
